<compile_context>
chip_gen: v7x
topology: tpu7x:2x2x1
jax: 0.10.0
libtpu: 0.0.40
codegen_flags: <defaults>
</compile_context>

<pallas_src>
import functools

import jax
import jax.numpy as jnp
from jax import lax
from jax.experimental import pallas as pl
from jax.experimental.pallas import tpu as pltpu


# ---------------------------------------------------------------------------
# Kernel 1: M = L^T @ L + rho * I   (single block; runs exactly once)
# ---------------------------------------------------------------------------
def _normal_eq_kernel(l_ref, m_ref, *, rho):
    L = l_ref[...]                                                       # [E, S]
    # Contract the leading E axis directly (no transpose, S stays on lanes).
    M = lax.dot_general(L, L, dimension_numbers=(((0,), (0,)), ((), ())),
                        preferred_element_type=jnp.float32)              # [S, S]
    S = M.shape[0]
    diag = (lax.broadcasted_iota(jnp.int32, (S, S), 0)
            == lax.broadcasted_iota(jnp.int32, (S, S), 1))
    m_ref[...] = (M + jnp.where(diag, jnp.float32(rho), jnp.float32(0.0))
                  ).astype(m_ref.dtype)


def normal_eq(L, rho):
    # TODO(synk): for large S (>~2k) tile the (S, S) output over (S//128, S//128)
    # blocks (or defer to XLA); a single full block is optimal at demo scale.
    E, S = L.shape
    return pl.pallas_call(
        functools.partial(_normal_eq_kernel, rho=float(rho)),
        out_shape=jax.ShapeDtypeStruct((S, S), jnp.float32),
        grid_spec=pltpu.PrefetchScalarGridSpec(
            num_scalar_prefetch=0,
            grid=(1,),
            in_specs=[pl.BlockSpec((E, S), lambda i: (0, 0))],
            out_specs=pl.BlockSpec((S, S), lambda i: (0, 0)),
        ),
    )(L)


# ---------------------------------------------------------------------------
# Kernel 2: fused reconstruction on lane-dense slabs (N = B*T on lanes)
#   out[:, tile] = A @ (L^T @ X[:, tile] + rho * (minus - multi)[:, tile])
# ---------------------------------------------------------------------------
def _recon_final_kernel(l_ref, a_ref, x_ref, minus_ref, multi_ref, o_ref, *, rho):
    L = l_ref[...]                                                       # [E, S]
    X = x_ref[...]                                                       # [E, Nt]
    ltx = lax.dot_general(L, X, dimension_numbers=(((0,), (0,)), ((), ())),
                          preferred_element_type=jnp.float32)            # [S, Nt]
    inner = ltx + jnp.float32(rho) * (minus_ref[...] - multi_ref[...])   # [S, Nt]
    o_ref[...] = jnp.dot(a_ref[...], inner,
                         preferred_element_type=jnp.float32).astype(o_ref.dtype)


def _reconstruct(L, A, x_slab, minus_slab, multi_slab, rho, *, n_tile=None):
    E, S = L.shape
    N = x_slab.shape[1]
    if n_tile is None or N % n_tile != 0:
        n_tile = N                        # demo-size: one lane-dense grid step
    grid = (N // n_tile,)
    # TODO(synk): for large S (A no longer VMEM-resident, esp. v7x 64 MiB) add an
    # S-tiled output phase with an explicit vmem_limit; not needed at demo scale.
    return pl.pallas_call(
        functools.partial(_recon_final_kernel, rho=float(rho)),
        out_shape=jax.ShapeDtypeStruct((S, N), jnp.float32),
        grid_spec=pltpu.PrefetchScalarGridSpec(
            num_scalar_prefetch=0,
            grid=grid,
            in_specs=[
                pl.BlockSpec((E, S), lambda n: (0, 0)),          # L  (resident)
                pl.BlockSpec((S, S), lambda n: (0, 0)),          # A  (resident)
                pl.BlockSpec((E, n_tile), lambda n: (0, n)),     # X slab tile
                pl.BlockSpec((S, n_tile), lambda n: (0, n)),     # minus tile
                pl.BlockSpec((S, n_tile), lambda n: (0, n)),     # multi tile
            ],
            out_specs=pl.BlockSpec((S, n_tile), lambda n: (0, n)),
        ),
        compiler_params=pltpu.CompilerParams(
            dimension_semantics=("parallel",)),
    )(L, A, x_slab, minus_slab, multi_slab)


# ---------------------------------------------------------------------------
# Module wrapper (forward pass of ReconstructionFinalLayer)
# ---------------------------------------------------------------------------
def reconstruction_final_layer(x, L, rho, *, n_tile=None):
    """x: dict with 'input' [B,E,T], 'minus_output' [B,S,T], 'multi_output' [B,S,T].
    L: [E,S] leadfield.  rho: static python float.  Returns [B,S,T]."""
    inp = x["input"]
    minus = x["minus_output"]
    multi = x["multi_output"]
    B, E, T = inp.shape
    S = L.shape[1]
    N = B * T

    # orig_output1 = woodbury_inv(L, rho)
    M = normal_eq(L, rho)                       # Pallas: L^T L + rho I
    # TODO(synk): dense matrix inverse has no clean Pallas equivalent; plain JAX.
    A = jnp.linalg.inv(M)

    # Lane-dense layout plumbing: collapse batch into the last (lane) axis.
    x_slab = jnp.transpose(inp, (1, 0, 2)).reshape(E, N)          # [E, B*T]
    minus_slab = jnp.transpose(minus, (1, 0, 2)).reshape(S, N)    # [S, B*T]
    multi_slab = jnp.transpose(multi, (1, 0, 2)).reshape(S, N)    # [S, B*T]

    y_slab = _reconstruct(L, A, x_slab, minus_slab, multi_slab, rho,
                          n_tile=n_tile)                          # [S, B*T]
    y = jnp.transpose(y_slab.reshape(S, B, T), (1, 0, 2))         # [B, S, T]

    x["re_final_output"] = y
    return x["re_final_output"]


if __name__ == "__main__":
    key = jax.random.PRNGKey(0)
    k_l, k_x, k_minus, k_multi = jax.random.split(key, 4)

    B, E, S, T = 2, 16, 32, 8
    rho = 0.5

    L = jax.random.normal(k_l, (E, S), dtype=jnp.float32)
    x_in = jax.random.normal(k_x, (B, E, T), dtype=jnp.float32)
    minus = jax.random.normal(k_minus, (B, S, T), dtype=jnp.float32)
    multi = jax.random.normal(k_multi, (B, S, T), dtype=jnp.float32)

    batch = {"input": x_in, "minus_output": minus, "multi_output": multi}
    y = reconstruction_final_layer(batch, L, rho)
    jax.block_until_ready(y)

    # Reference in plain JAX (matches the torch module exactly).
    A_ref = jnp.linalg.inv(L.T @ L + rho * jnp.eye(S, dtype=jnp.float32))
    inner_ref = jnp.einsum("es,bet->bst", L, x_in) + rho * (minus - multi)
    y_ref = jnp.einsum("sr,brt->bst", A_ref, inner_ref)

    assert y.shape == (B, S, T)
    assert jnp.allclose(y, y_ref, atol=1e-3, rtol=1e-3)

    print("KERNEL_OK")
</pallas_src>

<mosaic_0001>
module attributes {stable_mosaic.version = 11 : i64} {
  func.func @_normal_eq_kernel(%arg0: i32, %arg1: memref<16x32xf32, #tpu.memory_space<vmem>>, %arg2: memref<32x32xf32, #tpu.memory_space<vmem>>) attributes {dimension_semantics = [#tpu.dimension_semantics<arbitrary>], iteration_bounds = array<i64: 1>, scalar_prefetch = 0 : i64, scratch_operands = 0 : i64, tpu.core_type = #tpu.core_type<tc>, window_params = [{pipeline_mode = #tpu.pipeline_mode<synchronous>, transform_indices = @transform_0, window_bounds = array<i64: 16, 32>}, {pipeline_mode = #tpu.pipeline_mode<synchronous>, transform_indices = @transform_1, window_bounds = array<i64: 32, 32>}]} {
    %c0 = arith.constant 0 : index
    %c0_0 = arith.constant 0 : index
    %0 = vector.load %arg1[%c0, %c0_0] : memref<16x32xf32, #tpu.memory_space<vmem>>, vector<16x32xf32>
    %cst = arith.constant dense<0.000000e+00> : vector<32x32xf32>
    %1 = tpu.matmul %0, %0, %cst {dimension_numbers = #tpu.dot_dimension_numbers<[0], [0], [1], [1], [0, 1, 1, 1], [], []>} : vector<16x32xf32>, vector<16x32xf32>, vector<32x32xf32> -> vector<32x32xf32>
    %2 = tpu.iota {dimensions = array<i32: 0>} : vector<32x32xi32>
    %3 = tpu.iota {dimensions = array<i32: 1>} : vector<32x32xi32>
    %4 = arith.cmpi eq, %2, %3 : vector<32x32xi32>
    %cst_1 = arith.constant 5.000000e-01 : f32
    %cst_2 = arith.constant 0.000000e+00 : f32
    %5 = vector.broadcast %cst_1 : f32 to vector<32x32xf32>
    %6 = vector.broadcast %cst_2 : f32 to vector<32x32xf32>
    %7 = arith.select %4, %5, %6 : vector<32x32xi1>, vector<32x32xf32>
    %8 = arith.addf %1, %7 : vector<32x32xf32>
    %c0_3 = arith.constant 0 : index
    %c0_4 = arith.constant 0 : index
    %9 = vector.load %arg2[%c0_3, %c0_4] : memref<32x32xf32, #tpu.memory_space<vmem>>, vector<32x32xf32>
    tpu.vector_store %arg2[%c0_3, %c0_4], %8 {strides = array<i32>} : memref<32x32xf32, #tpu.memory_space<vmem>>, vector<32x32xf32>,
    return
  }
  func.func @transform_0(%arg0: i32) -> (i32, i32) {
    %c0_i32 = arith.constant 0 : i32
    %c0_i32_0 = arith.constant 0 : i32
    %c0_i32_1 = arith.constant 0 : i32
    return %c0_i32, %c0_i32_0 : i32, i32
  }
  func.func @transform_1(%arg0: i32) -> (i32, i32) {
    %c0_i32 = arith.constant 0 : i32
    %c0_i32_0 = arith.constant 0 : i32
    %c0_i32_1 = arith.constant 0 : i32
    return %c0_i32, %c0_i32_0 : i32, i32
  }
}

</mosaic_0001>

<bundles_post_ra>
// kernel: tpu_custom_call.1
= control target key start
LH: loop header
LB: loop body
LE: loop exit
PB: predicated region body
PF: predicated region fallthrough
CT: control target
= control target key end

     0   :  { %6 = vsyncpa [#allocation3], 0  ;;  %s320_s0 = inlined_call_operand.hbm [shape: f32[16,32], index: 0, kind: input, shape index: {}]   ;;  %s321_s1 = inlined_call_operand.hbm [shape: f32[32,32], index: 1, kind: output, shape index: {}]  }
   0x1   :  { %7 = vsyncpa [#allocation4], 0  ;;  %s271_s6 = smov [#allocation2]   ;;  %s223_s10 = scalar_lea.hbm %s320_s0, 256 }
   0x2   :  { %s13_s7 = sshll.u32 %s271_s6, 4  ;;  %p224_p0 = scmp.ne.s32.totalorder %s320_s0, %s223_s10  ;;  %s14_s7 = int_to_ptr.vmem [resolvable:$true] %s13_s7 }
   0x3   :  { %p227_p1 = scmp.lt.u32.totalorder %s223_s10, %s320_s0 }
   0x5   :  { %p229_p2 = pnand %p227_p1, %p224_p0 }
   0x7   :  { %232 = shalt.err (!%p229_p2)
}
   0x8   :  { %s233_s15 = scalar_lea.vmem %s14_s7, 256  ;;  %p238_p4 = scmp.lt.s32.totalorder %s14_s7, %s14_s7 }
   0x9   :  { %p234_p3 = scmp.ne.s32.totalorder %s14_s7, %s233_s15  ;;  %p239_p5 = scmp.lt.s32.totalorder %s233_s15, %s233_s15 }
   0xb   :  { %p240_p6 = por %p239_p5, %p238_p4 }
   0xd   :  { %p241_p7 = pnand %p240_p6, %p234_p3 }
   0xf   :  { %244 = shalt.err (!%p241_p7)
}
  0x10   :  { %s272_s16 = smov 128   ;;  %s273_s17 = smov 8  }
  0x11   :  { %19 = dma.hbm_to_vmem [thread:$0]  %s320_s0, 256, %s14_s7, [#allocation3], %s272_s16, %s272_s16, %s273_s17  }
  0x12   :  { %267 = dma.done.wait [#allocation3], 256  }
  0x13   :  { %268 = vsyncadd [#allocation3], 4294967040  ;;  %v23_v0 = vld [vmem:[#allocation2] sm:$0xff]  ;;  %v24_v1 = vld [vmem:[#allocation2 + $0x8] sm:$0xff]  ;;  %vm72_vm0 = vcmask 130048   ;;  %v25_v7 = vlaneseq  ;;  %v274_v11 = vmov 0.0  }
  0x14   :  { %40 = vxpose.xlu0.b32.start [1/2] (short) (narrow) %v23_v0, 32  ;;  %v212_v2 = vpack.c.bf16 %v24_v1, %v23_v0  ;;  %vm170_vm3 = vcmask 261120   ;;  %s275_s0 = smov [#allocation5]  }
  0x15   :  { %v26_v8 = vshrl.u32 %v25_v7, 7  ;;  %v31_v10 = vand.u32 127, %v25_v7  ;;  %s180_s20 = sshll.u32 %s275_s0, 4  ;;  %s181_s20 = int_to_ptr.vmem [resolvable:$true] %s180_s20 }
  0x16   :  { %213 = vmatprep.subr.bf16.mxu0 %v212_v2  ;;  %216 = vmatprep.subr.bf16.mxu1 %v212_v2  ;;  %s245_s21 = scalar_lea.vmem %s181_s20, 512  ;;  %p250_p9 = scmp.lt.s32.totalorder %s181_s20, %s181_s20 }
  0x17   :  { %215 = vmatpush3.bf16.msra.mxu0 %v212_v2  ;;  %217 = vmatpush3.bf16.msra.mxu1 %v212_v2  ;;  %v27_v9 = vadd.s32 8, %v26_v8  ;;  %vm32_vm2 = vcmp.eq.s32.totalorder %v26_v8, %v31_v10  ;;  %v29_v14 = vadd.s32 24, %v26_v8  ;;  %v28_v16 = vadd.s32 16, %v26_v8  ;;  %p246_p8 = scmp.ne.s32.totalorder %s181_s20, %s245_s21  ;;  %p251_p10 = scmp.lt.s32.totalorder %s245_s21, %s245_s21 }
  0x18   :  { %41 = vxpose.xlu0.b32.end [2/2] (short) (narrow) %v24_v1, 32  ;;  %v36_v13 = vsel %vm32_vm2, 0.5, %v274_v11 }
  0x19   :  { %vm33_vm1 = vcmp.eq.s32.totalorder %v27_v9, %v31_v10  ;;  %vm35_vm4 = vcmp.eq.s32.totalorder %v29_v14, %v31_v10  ;;  %vm34_vm5 = vcmp.eq.s32.totalorder %v28_v16, %v31_v10  ;;  %p252_p11 = por %p251_p10, %p250_p9 }
  0x1a   :  { %v37_v12 = vsel %vm33_vm1, 0.5, %v274_v11  ;;  %v39_v20 = vsel %vm35_vm4, 0.5, %v274_v11  ;;  %v38_v21 = vsel %vm34_vm5, 0.5, %v274_v11 }
  0x1b   :  { %p253_p12 = pnand %p252_p11, %p246_p8 }
  0x94   :  { %v56_v3 = vpop.trf.xlu0 }
  0x95   :  { %206 = vmatprep.mubr.msk.f32.mxu0 %vm72_vm0, %v56_v3 }
  0x98   :  { %v57_v4 = vpop.trf.xlu0 }
  0x99   :  { %207 = vmatmul.mubr.msk.f32.vlgmr.msra.gmra.mrb[0].mxu0 %vm72_vm0, %v57_v4 }
  0x9c   :  { %v58_v5 = vpop.trf.xlu0 }
  0x9d   :  { %209 = vmatprep.mubr.msk.f32.mxu1 %vm72_vm0, %v58_v5 }
  0xa0   :  { %v59_v6 = vpop.trf.xlu0 }
  0xa1   :  { %210 = vmatmul.mubr.msk.f32.vlgmr.msra.gmra.mrb[0].mxu1 %vm72_vm0, %v59_v6 }
 0x16c   :  { %v208_v15 = vpop.f32.mrb[0].mxu0 }
 0x16d   :  { %v157_v17 = vadd.f32 %v208_v15, %v37_v12  ;;  %v151_v18 = vpop.f32.mrb[1].mxu0 }
 0x16e   :  { %v152_v19 = vadd.f32 %v151_v18, %v36_v13 }
 0x16f   :  { %172 = vst.msk [vmem:[#allocation5 + $0x8] sm:$0xff] %vm170_vm3, %v157_v17 }
 0x170   :  { %171 = vst.msk [vmem:[#allocation5] sm:$0xff] %vm170_vm3, %v152_v19 }
 0x174   :  { %v211_v22 = vpop.f32.mrb[0].mxu1 }
 0x175   :  { %v167_v23 = vadd.f32 %v211_v22, %v39_v20  ;;  %v161_v24 = vpop.f32.mrb[1].mxu1 }
 0x176   :  { %v162_v25 = vadd.f32 %v161_v24, %v38_v21 }
 0x177   :  { %174 = vst.msk [vmem:[#allocation5 + $0x18] sm:$0xff] %vm170_vm3, %v167_v23 }
 0x178   :  { %173 = vst.msk [vmem:[#allocation5 + $0x10] sm:$0xff] %vm170_vm3, %v162_v25 }
 0x179   :  { %256 = shalt.err (!%p253_p12)
}
 0x17a   :  { %s257_s24 = scalar_lea.hbm %s321_s1, 512 }
 0x17b   :  { %p258_p13 = scmp.ne.s32.totalorder %s321_s1, %s257_s24  ;;  %p261_p0 = scmp.lt.u32.totalorder %s257_s24, %s321_s1 }
 0x17d   :  { %p263_p1 = pnand %p261_p0, %p258_p13 }
 0x17f   :  { %266 = shalt.err (!%p263_p1)
}
 0x180   :  { %186 = dma.vmem_to_hbm [thread:$0]  %s181_s20, 512, %s321_s1, [#allocation4], %s272_s16, %s272_s16, %s273_s17  }
 0x181   :  { %269 = dma.done.wait [#allocation4], 512  }
 0x182   :  { %270 = vsyncadd [#allocation4], 4294966784 }
 0x183   :  { %190 = vsyncpa [#allocation3], 1 }
 0x184   :  { %191 = vsyncpa [#allocation4], 1 }

</bundles_post_ra>
